<compile_context>
chip_gen: v6e
topology: v6e:2x2x1
jax: 0.10.0
libtpu: 0.0.40
codegen_flags: <defaults>
</compile_context>

<pallas_src>
import functools

import jax
import jax.numpy as jnp
from jax.experimental import pallas as pl
from jax.experimental.pallas import tpu as pltpu


def _round_up(v, m):
    return ((v + m - 1) // m) * m


# ---------------------------------------------------------------------------
# Aggregation kernel: out = A @ h, tiled reduction matmul.
# The f32 output block is resident across the reduction axis (same block index
# for every k), so it doubles as the accumulator -- no scratch buffer needed.
# ---------------------------------------------------------------------------
def agg_kernel(a_ref, h_ref, o_ref, *, tk, h_resident):
    k = pl.program_id(1)

    @pl.when(k == 0)
    def _():
        o_ref[...] = jnp.zeros_like(o_ref)

    if h_resident:
        # h lives fully in VMEM; slice the current reduction window out of it.
        start = pl.multiple_of(k * tk, tk)
        h_blk = h_ref[pl.ds(start, tk), :]
    else:
        h_blk = h_ref[...]

    o_ref[...] += jnp.dot(a_ref[...], h_blk, preferred_element_type=jnp.float32)


@functools.partial(jax.jit, static_argnames=("tm", "tk", "agg_dtype"))
def gcn_layer_pallas(x, edge_index, weight, bias, *, tm=512, tk=1024,
                     agg_dtype=jnp.bfloat16):
    """x: [N, C_in] f32, edge_index: [2, E] int32,
    weight: [C_out, C_in] (PyTorch nn.Linear layout), bias: [C_out]."""
    N, c_in = x.shape
    c_out = weight.shape[0]
    row, col = edge_index[0], edge_index[1]

    # ---- glue (plain JAX): degree, symmetric normalization (inf -> 0) ----
    deg = jnp.bincount(row, length=N).astype(jnp.float32)
    deg_inv_sqrt = jnp.where(deg > 0, jax.lax.rsqrt(deg), 0.0)
    norm = deg_inv_sqrt[row] * deg_inv_sqrt[col]

    # ---- linear: h = x @ W^T + b (K = c_in is tiny -> plain XLA, per review) ----
    h = (x @ weight.T + bias).astype(jnp.float32)

    # ---- tiling / padding: rows -> tm, reduction -> tk, lanes -> 128 ----
    c_out_pad = _round_up(c_out, 128)
    tm = min(tm, _round_up(N, 128))        # clamp for small graphs; stays a
    tk = min(tk, _round_up(N, 128))        # multiple of (8, 128)
    n_row_pad = _round_up(N, tm)           # output rows / A rows
    n_k_pad = _round_up(N, tk)             # reduction dim: A cols / h rows

    agg_bytes = jnp.dtype(agg_dtype).itemsize

    # Scatter-add in f32 (duplicate edges sum, matching torch.sparse semantics),
    # then quantize once to the aggregation dtype; padded rows/cols stay zero.
    a_dense = (jnp.zeros((n_row_pad, n_k_pad), jnp.float32)
               .at[row, col].add(norm)).astype(agg_dtype)
    h_pad = (jnp.zeros((n_k_pad, c_out_pad), jnp.float32)
             .at[:N, :c_out].set(h)).astype(agg_dtype)

    # Keep h fully VMEM-resident (fetched once) when the (double-buffered) copy
    # fits a 16 MiB budget; otherwise stream a (tk, c_out_pad) tile per step.
    h_resident = 2 * n_k_pad * c_out_pad * agg_bytes <= (16 << 20)
    if h_resident:
        h_spec = pl.BlockSpec((n_k_pad, c_out_pad), lambda i, k: (0, 0))
    else:
        h_spec = pl.BlockSpec((tk, c_out_pad), lambda i, k: (k, 0))

    grid = (n_row_pad // tm, n_k_pad // tk)

    # VMEM budget: double-buffered A tile + h + double-buffered f32 output tile.
    vmem_needed = (2 * tm * tk * agg_bytes
                   + (2 * n_k_pad * c_out_pad * agg_bytes if h_resident
                      else 2 * tk * c_out_pad * agg_bytes)
                   + 2 * tm * c_out_pad * 4)
    vmem_limit = min(max(vmem_needed + (8 << 20), 32 << 20), 56 << 20)

    h_reads = 1 if h_resident else grid[0]
    cost = pl.CostEstimate(
        flops=2 * n_row_pad * n_k_pad * c_out_pad,
        transcendentals=0,
        bytes_accessed=(n_row_pad * n_k_pad * agg_bytes
                        + h_reads * n_k_pad * c_out_pad * agg_bytes
                        + n_row_pad * c_out_pad * 4),
    )

    out_pad = pl.pallas_call(
        functools.partial(agg_kernel, tk=tk, h_resident=h_resident),
        out_shape=jax.ShapeDtypeStruct((n_row_pad, c_out_pad), jnp.float32),
        grid_spec=pltpu.PrefetchScalarGridSpec(
            num_scalar_prefetch=0,
            grid=grid,
            in_specs=[
                pl.BlockSpec((tm, tk), lambda i, k: (i, k)),
                h_spec,
            ],
            out_specs=pl.BlockSpec((tm, c_out_pad), lambda i, k: (i, 0)),
        ),
        compiler_params=pltpu.CompilerParams(
            dimension_semantics=("parallel", "arbitrary"),
            vmem_limit_bytes=vmem_limit),
        cost_estimate=cost,
    )(a_dense, h_pad)

    return out_pad[:N, :c_out]


def gcn_layer_ref(x, edge_index, weight, bias):
    """Pure-JAX f32 reference mirroring the PyTorch forward."""
    N = x.shape[0]
    row, col = edge_index[0], edge_index[1]
    deg = jnp.bincount(row, length=N).astype(jnp.float32)
    deg_inv_sqrt = jnp.where(deg > 0, deg ** -0.5, 0.0)
    norm = deg_inv_sqrt[row] * deg_inv_sqrt[col]
    h = x @ weight.T + bias
    a = jnp.zeros((N, N), jnp.float32).at[row, col].add(norm)
    return a @ h


if __name__ == "__main__":
    key = jax.random.PRNGKey(0)
    k_x, k_e1, k_e2, k_w, k_b = jax.random.split(key, 5)

    N, E = 16, 48            # nodes, edges
    in_channels, out_channels = 8, 32

    x = jax.random.normal(k_x, (N, in_channels), dtype=jnp.float32)
    # deterministic random graph; include self-loops so every node has degree > 0
    row = jnp.concatenate([jax.random.randint(k_e1, (E - N,), 0, N),
                           jnp.arange(N)]).astype(jnp.int32)
    col = jnp.concatenate([jax.random.randint(k_e2, (E - N,), 0, N),
                           jnp.arange(N)]).astype(jnp.int32)
    edge_index = jnp.stack([row, col], axis=0)

    # nn.Linear default init: U(-1/sqrt(fan_in), 1/sqrt(fan_in))
    bound = 1.0 / (in_channels ** 0.5)
    weight = jax.random.uniform(k_w, (out_channels, in_channels),
                                minval=-bound, maxval=bound, dtype=jnp.float32)
    bias = jax.random.uniform(k_b, (out_channels,),
                              minval=-bound, maxval=bound, dtype=jnp.float32)

    ref = gcn_layer_ref(x, edge_index, weight, bias)

    # f32 aggregation path: tight check of the kernel math.
    out_f32 = jax.block_until_ready(
        gcn_layer_pallas(x, edge_index, weight, bias, agg_dtype=jnp.float32))
    assert out_f32.shape == (N, out_channels)
    assert jnp.allclose(out_f32, ref, atol=1e-5, rtol=1e-5)

    # bf16 aggregation path (default, per perf review): relaxed tolerance.
    out_bf16 = jax.block_until_ready(
        gcn_layer_pallas(x, edge_index, weight, bias))
    assert out_bf16.shape == (N, out_channels)
    assert jnp.allclose(out_bf16, ref, atol=3e-2, rtol=3e-2)

    print("KERNEL_OK")
</pallas_src>

<mosaic_0001>
module attributes {stable_mosaic.version = 11 : i64} {
  func.func private @main(%arg0: i32) attributes {dimension_semantics = [#tpu.dimension_semantics<core_parallel>], iteration_bounds = array<i64: 2>, tpu.core_type = #tpu.core_type<sc_scalar_subcore>, window_params = []} {
    return
  }
}

module attributes {stable_mosaic.version = 11 : i64} {
  func.func private @main(%arg0: i32) attributes {dimension_semantics = [#tpu.dimension_semantics<core_parallel>], iteration_bounds = array<i64: 2>, tpu.core_type = #tpu.core_type<sc_scalar_subcore>, window_params = []} {
    return
  }
}

module attributes {stable_mosaic.version = 11 : i64} {
  func.func @agg_kernel(%arg0: i32, %arg1: i32, %arg2: memref<128x128xf32, #tpu.memory_space<vmem>>, %arg3: memref<128x128xf32, #tpu.memory_space<vmem>>, %arg4: memref<128x128xf32, #tpu.memory_space<vmem>>) attributes {dimension_semantics = [#tpu.dimension_semantics<parallel>, #tpu.dimension_semantics<arbitrary>], iteration_bounds = array<i64: 1, 1>, scalar_prefetch = 0 : i64, scratch_operands = 0 : i64, tpu.core_type = #tpu.core_type<tc>, window_params = [{transform_indices = @transform_0, window_bounds = array<i64: 128, 128>}, {pipeline_mode = #tpu.pipeline_mode<synchronous>, transform_indices = @transform_1, window_bounds = array<i64: 128, 128>}, {transform_indices = @transform_2, window_bounds = array<i64: 128, 128>}]} {
    %c0_i32 = arith.constant 0 : i32
    %0 = arith.cmpi eq, %arg1, %c0_i32 : i32
    %1 = arith.extui %0 : i1 to i32
    %c0_i32_0 = arith.constant 0 : i32
    %2 = arith.cmpi ne, %1, %c0_i32_0 : i32
    scf.if %2 {
      %cst_7 = arith.constant 0.000000e+00 : f32
      %12 = vector.broadcast %cst_7 : f32 to vector<128x128xf32>
      %c0_8 = arith.constant 0 : index
      %c0_9 = arith.constant 0 : index
      %13 = vector.load %arg4[%c0_8, %c0_9] : memref<128x128xf32, #tpu.memory_space<vmem>>, vector<128x128xf32>
      tpu.vector_store %arg4[%c0_8, %c0_9], %12 {strides = array<i32>} : memref<128x128xf32, #tpu.memory_space<vmem>>, vector<128x128xf32>,
    } else {
    }
    %c128_i32 = arith.constant 128 : i32
    %3 = arith.muli %arg1, %c128_i32 : i32
    %4 = tpu.assume_multiple %3, 128 : i32
    %5 = arith.index_cast %4 : i32 to index
    %c0 = arith.constant 0 : index
    %6 = vector.load %arg3[%5, %c0] : memref<128x128xf32, #tpu.memory_space<vmem>>, vector<128x128xf32>
    %c0_1 = arith.constant 0 : index
    %c0_2 = arith.constant 0 : index
    %7 = vector.load %arg4[%c0_1, %c0_2] : memref<128x128xf32, #tpu.memory_space<vmem>>, vector<128x128xf32>
    %c0_3 = arith.constant 0 : index
    %c0_4 = arith.constant 0 : index
    %8 = vector.load %arg2[%c0_3, %c0_4] : memref<128x128xf32, #tpu.memory_space<vmem>>, vector<128x128xf32>
    %cst = arith.constant dense<0.000000e+00> : vector<128x128xf32>
    %9 = tpu.matmul %8, %6, %cst {dimension_numbers = #tpu.dot_dimension_numbers<[1], [0], [0], [1], [0, 0, 1, 1], [], []>} : vector<128x128xf32>, vector<128x128xf32>, vector<128x128xf32> -> vector<128x128xf32>
    %10 = arith.addf %7, %9 : vector<128x128xf32>
    %c0_5 = arith.constant 0 : index
    %c0_6 = arith.constant 0 : index
    %11 = vector.load %arg4[%c0_5, %c0_6] : memref<128x128xf32, #tpu.memory_space<vmem>>, vector<128x128xf32>
    tpu.vector_store %arg4[%c0_5, %c0_6], %10 {strides = array<i32>} : memref<128x128xf32, #tpu.memory_space<vmem>>, vector<128x128xf32>,
    return
  }
  func.func @transform_0(%arg0: i32, %arg1: i32) -> (i32, i32) {
    %c0_i32 = arith.constant 0 : i32
    return %arg0, %arg1 : i32, i32
  }
  func.func @transform_1(%arg0: i32, %arg1: i32) -> (i32, i32) {
    %c0_i32 = arith.constant 0 : i32
    %c0_i32_0 = arith.constant 0 : i32
    %c0_i32_1 = arith.constant 0 : i32
    return %c0_i32, %c0_i32_0 : i32, i32
  }
  func.func @transform_2(%arg0: i32, %arg1: i32) -> (i32, i32) {
    %c0_i32 = arith.constant 0 : i32
    %c0_i32_0 = arith.constant 0 : i32
    return %arg0, %c0_i32 : i32, i32
  }
}

</mosaic_0001>

<bundles_post_ra>
// kernel: mul.1
= control target key start
LH: loop header
LB: loop body
LE: loop exit
PB: predicated region body
PF: predicated region fallthrough
CT: control target
= control target key end

     0   :  { %s34_s0 = inlined_call_operand.vmem [shape: f32[48], index: 0, kind: input, shape index: {}]   ;;  %s35_s1 = inlined_call_operand.vmem [shape: f32[48], index: 1, kind: input, shape index: {}]   ;;  %s36_s2 = inlined_call_operand.vmem [shape: f32[48], index: 2, kind: output, shape index: {}]  }
   0x1   :  { %v3_v0 = vld [vmem:[%s34_s0] sm:$0x1] }
   0x2   :  { %v4_v1 = vld [vmem:[%s35_s1] sm:$0x1] }
   0x3   :  { %v7_v2 = vmul.f32 %v4_v1, %v3_v0 }
   0x5   :  { %9 = vst [vmem:[%s36_s2] sm:$0x1] %v7_v2 }

// kernel: gcn_layer_pallas.1
= control target key start
LH: loop header
LB: loop body
LE: loop exit
PB: predicated region body
PF: predicated region fallthrough
CT: control target
= control target key end

     0   :  { %7 = vsyncpa [#allocation3], 0  ;;  %s423_s9 = smov [#allocation2]   ;;  %s540_s0 = inlined_call_operand.hbm [shape: f32[128,128], index: 0, kind: input, shape index: {}]   ;;  %s541_s1 = inlined_call_operand.vmem [shape: f32[128,128], index: 1, kind: input, shape index: {}]   ;;  %s542_s2 = inlined_call_operand.vmem [shape: f32[128,128], index: 2, kind: output, shape index: {}]  }
   0x1   :  { %s13_s10 = sshll.u32 %s423_s9, 4  ;;  %s14_s10 = int_to_ptr.vmem [resolvable:$true] %s13_s10 }
   0x2   :  { %s409_s11 = scalar_lea.vmem %s14_s10, 2048  ;;  %p414_p1 = scmp.lt.s32.totalorder %s14_s10, %s14_s10 }
   0x3   :  { %p410_p0 = scmp.ne.s32.totalorder %s14_s10, %s409_s11  ;;  %p415_p2 = scmp.lt.s32.totalorder %s409_s11, %s409_s11 }
   0x5   :  { %p416_p3 = por %p415_p2, %p414_p1 }
   0x7   :  { %p417_p4 = pnand %p416_p3, %p410_p0 }
   0x9   :  { %420 = shalt.err (!%p417_p4)
}
   0xa   :  { %s424_s12 = smov 128   ;;  %s425_s13 = smov 8  }
   0xb   :  { %19 = dma.hbm_to_vmem [thread:$0]  %s540_s0, 2048, %s14_s10, [#allocation3], %s424_s12, %s424_s12, %s425_s13  }
   0xc   :  { %421 = dma.done.wait [#allocation3], 2048  }
   0xd   :  { %422 = vsyncadd [#allocation3], 4294965248  ;;  %v62_v0 = vld [vmem:[%s541_s1 + $0x78] sm:$0xff]  ;;  %v61_v1 = vld [vmem:[%s541_s1 + $0x70] sm:$0xff] }
   0xe   :  { %309 = vmatprep.subr.mxu0 %v62_v0  ;;  %365 = vmatprep.subr.mxu1 %v62_v0  ;;  %v60_v2 = vld [vmem:[%s541_s1 + $0x68] sm:$0xff]  ;;  %v59_v3 = vld [vmem:[%s541_s1 + $0x60] sm:$0xff]  ;;  %v58_v4 = vld [vmem:[%s541_s1 + $0x58] sm:$0xff] }
   0xf   :  { %310 = vmatpush3.msra.mxu0 %v62_v0  ;;  %381 = vmatpush3.msra.mxu1 %v62_v0  ;;  %v57_v5 = vld [vmem:[%s541_s1 + $0x50] sm:$0xff]  ;;  %v56_v6 = vld [vmem:[%s541_s1 + $0x48] sm:$0xff]  ;;  %v55_v7 = vld [vmem:[%s541_s1 + $0x40] sm:$0xff] }
  0x10   :  { %311 = vmatprep.subr.mxu0 %v61_v1  ;;  %366 = vmatprep.subr.mxu1 %v61_v1  ;;  %v54_v8 = vld [vmem:[%s541_s1 + $0x38] sm:$0xff]  ;;  %v53_v9 = vld [vmem:[%s541_s1 + $0x30] sm:$0xff]  ;;  %v52_v10 = vld [vmem:[%s541_s1 + $0x28] sm:$0xff] }
  0x11   :  { %312 = vmatpush3.msra.mxu0 %v61_v1  ;;  %382 = vmatpush3.msra.mxu1 %v61_v1  ;;  %v51_v11 = vld [vmem:[%s541_s1 + $0x20] sm:$0xff]  ;;  %v50_v12 = vld [vmem:[%s541_s1 + $0x18] sm:$0xff]  ;;  %v49_v13 = vld [vmem:[%s541_s1 + $0x10] sm:$0xff] }
  0x12   :  { %313 = vmatprep.subr.mxu0 %v60_v2  ;;  %367 = vmatprep.subr.mxu1 %v60_v2  ;;  %v48_v14 = vld [vmem:[%s541_s1 + $0x8] sm:$0xff]  ;;  %v47_v15 = vld [vmem:[%s541_s1] sm:$0xff]  ;;  %v80_v18 = vld [vmem:[#allocation2 + $0x8] sm:$0xff] }
  0x13   :  { %314 = vmatpush3.msra.mxu0 %v60_v2  ;;  %383 = vmatpush3.msra.mxu1 %v60_v2  ;;  %v79_v16 = vld [vmem:[#allocation2] sm:$0xff]  ;;  %v88_v19 = vld [vmem:[#allocation2 + $0x48] sm:$0xff]  ;;  %v81_v20 = vld [vmem:[#allocation2 + $0x10] sm:$0xff] }
  0x14   :  { %315 = vmatprep.subr.mxu0 %v59_v3  ;;  %368 = vmatprep.subr.mxu1 %v59_v3  ;;  %v87_v17 = vld [vmem:[#allocation2 + $0x40] sm:$0xff]  ;;  %v89_v21 = vld [vmem:[#allocation2 + $0x50] sm:$0xff]  ;;  %v82_v22 = vld [vmem:[#allocation2 + $0x18] sm:$0xff] }
  0x15   :  { %316 = vmatpush3.msra.mxu0 %v59_v3  ;;  %384 = vmatpush3.msra.mxu1 %v59_v3  ;;  %v90_v23 = vld [vmem:[#allocation2 + $0x58] sm:$0xff]  ;;  %v83_v24 = vld [vmem:[#allocation2 + $0x20] sm:$0xff]  ;;  %v84_v26 = vld [vmem:[#allocation2 + $0x28] sm:$0xff] }
  0x16   :  { %317 = vmatprep.subr.mxu0 %v58_v4  ;;  %369 = vmatprep.subr.mxu1 %v58_v4  ;;  %v91_v25 = vld [vmem:[#allocation2 + $0x60] sm:$0xff]  ;;  %v92_v27 = vld [vmem:[#allocation2 + $0x68] sm:$0xff]  ;;  %v85_v28 = vld [vmem:[#allocation2 + $0x30] sm:$0xff] }
  0x17   :  { %318 = vmatpush3.msra.mxu0 %v58_v4  ;;  %385 = vmatpush3.msra.mxu1 %v58_v4  ;;  %v93_v29 = vld [vmem:[#allocation2 + $0x70] sm:$0xff]  ;;  %v86_v30 = vld [vmem:[#allocation2 + $0x38] sm:$0xff] }
  0x18   :  { %319 = vmatprep.subr.mxu0 %v57_v5  ;;  %370 = vmatprep.subr.mxu1 %v57_v5  ;;  %v94_v31 = vld [vmem:[#allocation2 + $0x78] sm:$0xff] }
  0x19   :  { %320 = vmatpush3.msra.mxu0 %v57_v5  ;;  %386 = vmatpush3.msra.mxu1 %v57_v5 }
  0x1a   :  { %321 = vmatprep.subr.mxu0 %v56_v6  ;;  %371 = vmatprep.subr.mxu1 %v56_v6 }
  0x1b   :  { %322 = vmatpush3.msra.mxu0 %v56_v6  ;;  %387 = vmatpush3.msra.mxu1 %v56_v6 }
  0x1c   :  { %323 = vmatprep.subr.mxu0 %v55_v7  ;;  %372 = vmatprep.subr.mxu1 %v55_v7 }
  0x1d   :  { %324 = vmatpush3.msra.mxu0 %v55_v7  ;;  %388 = vmatpush3.msra.mxu1 %v55_v7 }
  0x1e   :  { %325 = vmatprep.subr.mxu0 %v54_v8  ;;  %373 = vmatprep.subr.mxu1 %v54_v8 }
  0x1f   :  { %326 = vmatpush3.msra.mxu0 %v54_v8  ;;  %389 = vmatpush3.msra.mxu1 %v54_v8 }
  0x20   :  { %327 = vmatprep.subr.mxu0 %v53_v9  ;;  %374 = vmatprep.subr.mxu1 %v53_v9 }
  0x21   :  { %328 = vmatpush3.msra.mxu0 %v53_v9  ;;  %390 = vmatpush3.msra.mxu1 %v53_v9 }
  0x22   :  { %329 = vmatprep.subr.mxu0 %v52_v10  ;;  %375 = vmatprep.subr.mxu1 %v52_v10 }
  0x23   :  { %330 = vmatpush3.msra.mxu0 %v52_v10  ;;  %391 = vmatpush3.msra.mxu1 %v52_v10 }
  0x24   :  { %331 = vmatprep.subr.mxu0 %v51_v11  ;;  %376 = vmatprep.subr.mxu1 %v51_v11 }
  0x25   :  { %332 = vmatpush3.msra.mxu0 %v51_v11  ;;  %392 = vmatpush3.msra.mxu1 %v51_v11 }
  0x26   :  { %333 = vmatprep.subr.mxu0 %v50_v12  ;;  %377 = vmatprep.subr.mxu1 %v50_v12 }
  0x27   :  { %334 = vmatpush3.msra.mxu0 %v50_v12  ;;  %393 = vmatpush3.msra.mxu1 %v50_v12 }
  0x28   :  { %335 = vmatprep.subr.mxu0 %v49_v13  ;;  %378 = vmatprep.subr.mxu1 %v49_v13 }
  0x29   :  { %336 = vmatpush3.msra.mxu0 %v49_v13  ;;  %394 = vmatpush3.msra.mxu1 %v49_v13 }
  0x2a   :  { %337 = vmatprep.subr.mxu0 %v48_v14  ;;  %379 = vmatprep.subr.mxu1 %v48_v14 }
  0x2b   :  { %338 = vmatpush3.msra.mxu0 %v48_v14  ;;  %395 = vmatpush3.msra.mxu1 %v48_v14 }
  0x2c   :  { %339 = vmatprep.subr.mxu0 %v47_v15  ;;  %380 = vmatprep.subr.mxu1 %v47_v15 }
  0x2d   :  { %340 = vmatpush3.msra.mxu0 %v47_v15  ;;  %396 = vmatpush3.msra.mxu1 %v47_v15 }
  0x2e   :  { %341 = vmatprep.mubr.f32.mxu0 %v79_v16  ;;  %353 = vmatprep.mubr.f32.mxu1 %v87_v17 }
  0x2f   :  { %342 = vmatmul.mubr.f32.vlgmr.msra.gmra.mxu0 %v80_v18  ;;  %354 = vmatmul.mubr.f32.vlgmr.msra.gmra.mxu1 %v88_v19 }
  0x30   :  { %344 = vmatprep.mubr.f32.mxu0 %v81_v20  ;;  %356 = vmatprep.mubr.f32.mxu1 %v89_v21 }
  0x33   :  { %345 = vmatmul.mubr.f32.gmra.mxu0 %v82_v22  ;;  %357 = vmatmul.mubr.f32.gmra.mxu1 %v90_v23 }
  0x34   :  { %347 = vmatprep.mubr.f32.mxu0 %v83_v24  ;;  %359 = vmatprep.mubr.f32.mxu1 %v91_v25 }
  0x37   :  { %348 = vmatmul.mubr.f32.gmra.mxu0 %v84_v26  ;;  %360 = vmatmul.mubr.f32.gmra.mxu1 %v92_v27 }
  0x38   :  { %350 = vmatprep.mubr.f32.mxu0 %v85_v28  ;;  %362 = vmatprep.mubr.f32.mxu1 %v93_v29 }
  0x3b   :  { %351 = vmatmul.mubr.f32.gmra.mxu0 %v86_v30  ;;  %363 = vmatmul.mubr.f32.gmra.mxu1 %v94_v31 }
  0xef   :  { %v343_v32 = vpop.f32.mrf.mxu0  ;;  %v355_v33 = vpop.f32.mrf.mxu1 }
  0xf0   :  { %257 = vst [vmem:[%s542_s2 + $0x8] sm:$0xff] %v343_v32  ;;  %265 = vst [vmem:[%s542_s2 + $0x48] sm:$0xff] %v355_v33 }
  0xf1   :  { %v161_v34 = vpop.f32.mrf.mxu0  ;;  %v201_v35 = vpop.f32.mrf.mxu1 }
  0xf2   :  { %256 = vst [vmem:[%s542_s2] sm:$0xff] %v161_v34  ;;  %264 = vst [vmem:[%s542_s2 + $0x40] sm:$0xff] %v201_v35 }
  0xf3   :  { %v346_v36 = vpop.f32.mrf.mxu0  ;;  %v358_v37 = vpop.f32.mrf.mxu1 }
  0xf4   :  { %259 = vst [vmem:[%s542_s2 + $0x18] sm:$0xff] %v346_v36  ;;  %267 = vst [vmem:[%s542_s2 + $0x58] sm:$0xff] %v358_v37 }
  0xf5   :  { %v171_v38 = vpop.f32.mrf.mxu0  ;;  %v211_v39 = vpop.f32.mrf.mxu1 }
  0xf6   :  { %258 = vst [vmem:[%s542_s2 + $0x10] sm:$0xff] %v171_v38  ;;  %266 = vst [vmem:[%s542_s2 + $0x50] sm:$0xff] %v211_v39 }
  0xf7   :  { %v349_v40 = vpop.f32.mrf.mxu0  ;;  %v361_v41 = vpop.f32.mrf.mxu1 }
  0xf8   :  { %261 = vst [vmem:[%s542_s2 + $0x28] sm:$0xff] %v349_v40  ;;  %269 = vst [vmem:[%s542_s2 + $0x68] sm:$0xff] %v361_v41 }
  0xf9   :  { %v181_v42 = vpop.f32.mrf.mxu0  ;;  %v221_v43 = vpop.f32.mrf.mxu1 }
  0xfa   :  { %260 = vst [vmem:[%s542_s2 + $0x20] sm:$0xff] %v181_v42  ;;  %268 = vst [vmem:[%s542_s2 + $0x60] sm:$0xff] %v221_v43 }
  0xfb   :  { %v352_v44 = vpop.f32.mrf.mxu0  ;;  %v364_v45 = vpop.f32.mrf.mxu1 }
  0xfc   :  { %263 = vst [vmem:[%s542_s2 + $0x38] sm:$0xff] %v352_v44  ;;  %271 = vst [vmem:[%s542_s2 + $0x78] sm:$0xff] %v364_v45 }
  0xfd   :  { %v191_v46 = vpop.f32.mrf.mxu0  ;;  %v231_v47 = vpop.f32.mrf.mxu1 }
  0xfe   :  { %262 = vst [vmem:[%s542_s2 + $0x30] sm:$0xff] %v191_v46  ;;  %270 = vst [vmem:[%s542_s2 + $0x70] sm:$0xff] %v231_v47 }
  0xff   :  { %276 = vsyncpa [#allocation3], 1 }

</bundles_post_ra>
